<compile_context>
chip_gen: v7x
topology: tpu7x:2x2x1
jax: 0.10.0
libtpu: 0.0.40
codegen_flags: <defaults>
</compile_context>

<pallas_src>
import jax
import jax.numpy as jnp
from jax.experimental import pallas as pl
from jax.experimental.pallas import tpu as pltpu


# ------------------------------ Pallas kernel -------------------------------


def _houlsby_kernel(x_ref, wt_ref, b_ref, at_ref, ab_ref, ut_ref, ub_ref, o_ref):
    """Fused Houlsby adapter on one row-tile.

    y  = x @ Wt + b      (pretrained linear)
    d  = y @ At + ab     (down projection)
    a  = d * sigmoid(d)  (Swish / SiLU, beta=1)  -> EUP sigmoid + VPU mul
    o  = a @ Ut + ub + y (up projection + residual)
    """
    x = x_ref[...]
    y = jnp.dot(x, wt_ref[...], preferred_element_type=jnp.float32) + b_ref[...]
    d = jnp.dot(y, at_ref[...], preferred_element_type=jnp.float32) + ab_ref[...]
    a = d * jax.nn.sigmoid(d)
    up = jnp.dot(a, ut_ref[...], preferred_element_type=jnp.float32) + ub_ref[...]
    o_ref[...] = (up + y).astype(o_ref.dtype)


# -------------------------------- wrapper ------------------------------------


def _round_up(x, m):
    return (x + m - 1) // m * m


def houlsby_adapter_linear(x, w, b, a_w, a_b, u_w, u_b, *, row_tile=128):
    """x: (..., d_in). w: (d_out, d_in). a_w: (proj, d_out). u_w: (d_out, proj)."""
    *lead, d_in = x.shape
    d_out = w.shape[0]
    proj = a_w.shape[0]

    # Flatten leading dims -> rows; pad rows to a multiple of the row tile
    # (tile is a multiple of 8 sublanes).
    x2 = x.reshape(-1, d_in)
    m = x2.shape[0]
    tm = min(_round_up(row_tile, 8), _round_up(m, 8))
    m_pad = _round_up(m, tm)
    if m_pad != m:
        x2 = jnp.pad(x2, ((0, m_pad - m), (0, 0)))

    # One-time layout prep for the frozen parameters: pre-transpose so the
    # kernel needs no in-kernel transpose, and make biases 2-D (1, N).
    wt = jnp.transpose(w)        # (d_in,  d_out)
    at = jnp.transpose(a_w)      # (d_out, proj)
    ut = jnp.transpose(u_w)      # (proj,  d_out)
    b2 = b.reshape(1, d_out)
    ab2 = a_b.reshape(1, proj)
    ub2 = u_b.reshape(1, d_out)

    grid = (m_pad // tm,)

    out = pl.pallas_call(
        _houlsby_kernel,
        out_shape=jax.ShapeDtypeStruct((m_pad, d_out), x.dtype),
        grid=grid,
        in_specs=[
            pl.BlockSpec((tm, d_in), lambda i: (i, 0)),      # activations: row-tiled
            pl.BlockSpec((d_in, d_out), lambda i: (0, 0)),   # Wt   (resident)
            pl.BlockSpec((1, d_out), lambda i: (0, 0)),      # b
            pl.BlockSpec((d_out, proj), lambda i: (0, 0)),   # At
            pl.BlockSpec((1, proj), lambda i: (0, 0)),       # a_b
            pl.BlockSpec((proj, d_out), lambda i: (0, 0)),   # Ut
            pl.BlockSpec((1, d_out), lambda i: (0, 0)),      # u_b
        ],
        out_specs=pl.BlockSpec((tm, d_out), lambda i: (i, 0)),
        compiler_params=pltpu.CompilerParams(
            dimension_semantics=("parallel",),
        ),
    )(x2, wt, b2, at, ab2, ut, ub2)

    out = out[:m]
    return out.reshape(*lead, d_out)


# ------------------------------- reference -----------------------------------


def reference_forward(x, w, b, a_w, a_b, u_w, u_b):
    y = x @ w.T + b
    d = y @ a_w.T + a_b
    a = d * jax.nn.sigmoid(d)          # Swish(beta=1) == SiLU
    return a @ u_w.T + u_b + y


# ---------------------------------- main --------------------------------------


if __name__ == "__main__":
    key = jax.random.PRNGKey(0)
    ks = jax.random.split(key, 8)

    batch, time, d_model, proj = 2, 24, 64, 8

    def init(k, shape, scale=0.1):
        return (scale * jax.random.normal(k, shape)).astype(jnp.float32)

    # pretrained Linear(d_model, d_model), PyTorch (out, in) layout
    w = init(ks[0], (d_model, d_model))
    b = init(ks[1], (d_model,))
    # adapter_down_proj: Linear(d_model, proj).  (SpeechBrain zero-inits adapter
    # biases; we use small random values so the adapter path is exercised.)
    a_w = init(ks[2], (proj, d_model))
    a_b = init(ks[3], (proj,))
    # adapter_up_proj: Linear(proj, d_model)
    u_w = init(ks[4], (d_model, proj))
    u_b = init(ks[5], (d_model,))

    x = init(ks[6], (batch, time, d_model), scale=1.0)

    out = houlsby_adapter_linear(x, w, b, a_w, a_b, u_w, u_b, row_tile=16)
    out = jax.block_until_ready(out)

    ref = reference_forward(x, w, b, a_w, a_b, u_w, u_b)
    assert out.shape == (batch, time, d_model), out.shape
    assert jnp.allclose(out, ref, atol=1e-5, rtol=1e-5), (
        f"max abs err = {jnp.max(jnp.abs(out - ref))}"
    )

    print("KERNEL_OK")
</pallas_src>

<mosaic_0001>
module attributes {stable_mosaic.version = 11 : i64} {
  func.func @_houlsby_kernel(%arg0: i32, %arg1: memref<16x64xf32, #tpu.memory_space<vmem>>, %arg2: memref<64x64xf32, #tpu.memory_space<vmem>>, %arg3: memref<1x64xf32, #tpu.memory_space<vmem>>, %arg4: memref<64x8xf32, #tpu.memory_space<vmem>>, %arg5: memref<1x8xf32, #tpu.memory_space<vmem>>, %arg6: memref<8x64xf32, #tpu.memory_space<vmem>>, %arg7: memref<1x64xf32, #tpu.memory_space<vmem>>, %arg8: memref<16x64xf32, #tpu.memory_space<vmem>>) attributes {dimension_semantics = [#tpu.dimension_semantics<parallel>], iteration_bounds = array<i64: 3>, scalar_prefetch = 0 : i64, scratch_operands = 0 : i64, tpu.core_type = #tpu.core_type<tc>, window_params = [{transform_indices = @transform_0, window_bounds = array<i64: 16, 64>}, {pipeline_mode = #tpu.pipeline_mode<synchronous>, transform_indices = @transform_1, window_bounds = array<i64: 64, 64>}, {pipeline_mode = #tpu.pipeline_mode<synchronous>, transform_indices = @transform_2, window_bounds = array<i64: 1, 64>}, {pipeline_mode = #tpu.pipeline_mode<synchronous>, transform_indices = @transform_3, window_bounds = array<i64: 64, 8>}, {pipeline_mode = #tpu.pipeline_mode<synchronous>, transform_indices = @transform_4, window_bounds = array<i64: 1, 8>}, {pipeline_mode = #tpu.pipeline_mode<synchronous>, transform_indices = @transform_5, window_bounds = array<i64: 8, 64>}, {pipeline_mode = #tpu.pipeline_mode<synchronous>, transform_indices = @transform_6, window_bounds = array<i64: 1, 64>}, {transform_indices = @transform_7, window_bounds = array<i64: 16, 64>}]} {
    %c0 = arith.constant 0 : index
    %c0_0 = arith.constant 0 : index
    %0 = vector.load %arg1[%c0, %c0_0] : memref<16x64xf32, #tpu.memory_space<vmem>>, vector<16x64xf32>
    %c0_1 = arith.constant 0 : index
    %c0_2 = arith.constant 0 : index
    %1 = vector.load %arg2[%c0_1, %c0_2] : memref<64x64xf32, #tpu.memory_space<vmem>>, vector<64x64xf32>
    %cst = arith.constant dense<0.000000e+00> : vector<16x64xf32>
    %2 = tpu.matmul %0, %1, %cst {dimension_numbers = #tpu.dot_dimension_numbers<[1], [0], [0], [1], [0, 0, 1, 1], [], []>} : vector<16x64xf32>, vector<64x64xf32>, vector<16x64xf32> -> vector<16x64xf32>
    %c0_3 = arith.constant 0 : index
    %c0_4 = arith.constant 0 : index
    %3 = vector.load %arg3[%c0_3, %c0_4] : memref<1x64xf32, #tpu.memory_space<vmem>>, vector<1x64xf32>
    %4 = vector.broadcast %3 : vector<1x64xf32> to vector<16x64xf32>
    %5 = arith.addf %2, %4 : vector<16x64xf32>
    %c0_5 = arith.constant 0 : index
    %c0_6 = arith.constant 0 : index
    %6 = vector.load %arg4[%c0_5, %c0_6] : memref<64x8xf32, #tpu.memory_space<vmem>>, vector<64x8xf32>
    %cst_7 = arith.constant dense<0.000000e+00> : vector<16x8xf32>
    %7 = tpu.matmul %5, %6, %cst_7 {dimension_numbers = #tpu.dot_dimension_numbers<[1], [0], [0], [1], [0, 0, 1, 1], [], []>} : vector<16x64xf32>, vector<64x8xf32>, vector<16x8xf32> -> vector<16x8xf32>
    %c0_8 = arith.constant 0 : index
    %c0_9 = arith.constant 0 : index
    %8 = vector.load %arg5[%c0_8, %c0_9] : memref<1x8xf32, #tpu.memory_space<vmem>>, vector<1x8xf32>
    %9 = vector.broadcast %8 : vector<1x8xf32> to vector<16x8xf32>
    %10 = arith.addf %7, %9 : vector<16x8xf32>
    %11 = arith.negf %10 : vector<16x8xf32>
    %12 = math.exp %11 : vector<16x8xf32>
    %cst_10 = arith.constant 1.000000e+00 : f32
    %13 = vector.broadcast %cst_10 : f32 to vector<16x8xf32>
    %14 = arith.addf %13, %12 : vector<16x8xf32>
    %15 = arith.divf %13, %14 : vector<16x8xf32>
    %16 = arith.mulf %10, %15 : vector<16x8xf32>
    %c0_11 = arith.constant 0 : index
    %c0_12 = arith.constant 0 : index
    %17 = vector.load %arg6[%c0_11, %c0_12] : memref<8x64xf32, #tpu.memory_space<vmem>>, vector<8x64xf32>
    %cst_13 = arith.constant dense<0.000000e+00> : vector<16x64xf32>
    %18 = tpu.matmul %16, %17, %cst_13 {dimension_numbers = #tpu.dot_dimension_numbers<[1], [0], [0], [1], [0, 0, 1, 1], [], []>} : vector<16x8xf32>, vector<8x64xf32>, vector<16x64xf32> -> vector<16x64xf32>
    %c0_14 = arith.constant 0 : index
    %c0_15 = arith.constant 0 : index
    %19 = vector.load %arg7[%c0_14, %c0_15] : memref<1x64xf32, #tpu.memory_space<vmem>>, vector<1x64xf32>
    %20 = vector.broadcast %19 : vector<1x64xf32> to vector<16x64xf32>
    %21 = arith.addf %18, %20 : vector<16x64xf32>
    %22 = arith.addf %21, %5 : vector<16x64xf32>
    %c0_16 = arith.constant 0 : index
    %c0_17 = arith.constant 0 : index
    %23 = vector.load %arg8[%c0_16, %c0_17] : memref<16x64xf32, #tpu.memory_space<vmem>>, vector<16x64xf32>
    tpu.vector_store %arg8[%c0_16, %c0_17], %22 {strides = array<i32>} : memref<16x64xf32, #tpu.memory_space<vmem>>, vector<16x64xf32>,
    return
  }
  func.func @transform_0(%arg0: i32) -> (i32, i32) {
    %c0_i32 = arith.constant 0 : i32
    %c0_i32_0 = arith.constant 0 : i32
    return %arg0, %c0_i32 : i32, i32
  }
  func.func @transform_1(%arg0: i32) -> (i32, i32) {
    %c0_i32 = arith.constant 0 : i32
    %c0_i32_0 = arith.constant 0 : i32
    %c0_i32_1 = arith.constant 0 : i32
    return %c0_i32, %c0_i32_0 : i32, i32
  }
  func.func @transform_2(%arg0: i32) -> (i32, i32) {
    %c0_i32 = arith.constant 0 : i32
    %c0_i32_0 = arith.constant 0 : i32
    %c0_i32_1 = arith.constant 0 : i32
    return %c0_i32, %c0_i32_0 : i32, i32
  }
  func.func @transform_3(%arg0: i32) -> (i32, i32) {
    %c0_i32 = arith.constant 0 : i32
    %c0_i32_0 = arith.constant 0 : i32
    %c0_i32_1 = arith.constant 0 : i32
    return %c0_i32, %c0_i32_0 : i32, i32
  }
  func.func @transform_4(%arg0: i32) -> (i32, i32) {
    %c0_i32 = arith.constant 0 : i32
    %c0_i32_0 = arith.constant 0 : i32
    %c0_i32_1 = arith.constant 0 : i32
    return %c0_i32, %c0_i32_0 : i32, i32
  }
  func.func @transform_5(%arg0: i32) -> (i32, i32) {
    %c0_i32 = arith.constant 0 : i32
    %c0_i32_0 = arith.constant 0 : i32
    %c0_i32_1 = arith.constant 0 : i32
    return %c0_i32, %c0_i32_0 : i32, i32
  }
  func.func @transform_6(%arg0: i32) -> (i32, i32) {
    %c0_i32 = arith.constant 0 : i32
    %c0_i32_0 = arith.constant 0 : i32
    %c0_i32_1 = arith.constant 0 : i32
    return %c0_i32, %c0_i32_0 : i32, i32
  }
  func.func @transform_7(%arg0: i32) -> (i32, i32) {
    %c0_i32 = arith.constant 0 : i32
    %c0_i32_0 = arith.constant 0 : i32
    return %arg0, %c0_i32 : i32, i32
  }
}

</mosaic_0001>

<bundles_post_ra>
// kernel: tpu_custom_call.1
= control target key start
LH: loop header
LB: loop body
LE: loop exit
PB: predicated region body
PF: predicated region fallthrough
CT: control target
= control target key end

     0   :  { %12 = vsyncpa [#allocation3], 0  ;;  %s1250_s0 = inlined_call_operand.hbm [shape: f32[48,64], index: 0, kind: input, shape index: {}]   ;;  %s1251_s1 = inlined_call_operand.vmem [shape: f32[64,64], index: 1, kind: input, shape index: {}]   ;;  %s1252_s2 = inlined_call_operand.vmem [shape: f32[1,64], index: 2, kind: input, shape index: {}]   ;;  %s1253_s3 = inlined_call_operand.vmem [shape: f32[64,8], index: 3, kind: input, shape index: {}]   ;;  %s1254_s4 = inlined_call_operand.vmem [shape: f32[1,8], index: 4, kind: input, shape index: {}]   ;;  %s1255_s5 = inlined_call_operand.vmem [shape: f32[8,64], index: 5, kind: input, shape index: {}]   ;;  %s1256_s6 = inlined_call_operand.vmem [shape: f32[1,64], index: 6, kind: input, shape index: {}]   ;;  %s1257_s7 = inlined_call_operand.hbm [shape: f32[48,64], index: 7, kind: output, shape index: {}]  }
   0x1   :  { %14 = vsyncpa [#allocation3 + $0x1], 0 }
   0x2   :  { %15 = vsyncpa [#allocation4], 0 }
   0x3   :  { %17 = vsyncpa [#allocation4 + $0x1], 0  ;;  %s1016_s24 = smov 0   ;;  %s1018_s25 = smov 0  }
   0x4   :  { %s1020_s26 = smov 0   ;;  %s1022_s27 = smov 0  }
   0x5 LB: > { %s1037_s28 = sadd.s32 4294967295, %s968_s27   ;;  %s689_s29 = sadd.s32 4294967294, %s968_s27   ;;  %s968_s27 = sphi %s1022_s27, %s1269_s27   ;;  %s964_s26 = sphi %s1020_s26, %s1268_s26   ;;  %s960_s25 = sphi %s1018_s25, %s1267_s25   ;;  %s956_s24 = sphi %s1016_s24, %s1266_s24  }
   0x6   : > { %s1041_s30 = sadd.s32 1, %s968_s27   ;;  %s30_s8 = sadd.s32 1, %s964_s26 }
   0x7   : > { %s27_s9 = ssub.s32 %s968_s27, %s1041_s30  ;;  %p37_p0 = scmp.ne.s32.totalorder %s964_s26, %s960_s25 }
   0x8   : > { %p28_p1 = scmp.eq.s32.totalorder %s27_s9, 0  ;;  %p38_p2 = scmp.eq.s32.totalorder %s968_s27, 0 }
   0x9   : > { %p43_p3 = scmp.ne.s32.totalorder %s960_s25, %s956_s24  ;;  %p44_p4 = scmp.eq.s32.totalorder %s1037_s28, 0 }
   0xa   : > { %s1053_s10 = scalar_select %p28_p1, %s964_s26, %s30_s8  }
   0xb   : > { %p1055_p5 = por %p38_p2, %p37_p0  ;;  %p1059_p6 = por %p44_p4, %p43_p3 }
   0xc   : > { %p193_p7 = scmp.eq.s32.totalorder %s1037_s28, 2  ;;  %p199_p8 = scmp.eq.s32.totalorder %s689_s29, 2 }
   0xd   : > { %p826_p9 = scmp.lt.s32.totalorder %s968_s27, 3  ;;  %s237_s15 = sand.u32 1, %s964_s26  }
   0xe   : > { %p1065_p10 = por %p193_p7, %p37_p0  ;;  %p1069_p11 = por %p199_p8, %p43_p3 }
   0xf   : > { %s714_s16 = sshll.u32 %s968_s27, 8  ;;  %s692_s17 = sshll.u32 %s237_s15, 4 }
  0x10   : > { %s1261_s13 = scalar_select %p1065_p10, 1, 0 }
  0x11   : > { %s1262_s14 = scalar_select %p1069_p11, 1, 0 }
  0x12   : > { %s1078_s20 = scalar_lea.hbm %s1250_s0, %s714_s16  ;;  %s241_s21 = scalar_lea.vmem [#allocation2], %s692_s17 }
  0x13   : > { %s248_s22 = sshll.u32 %s241_s21, 4  ;;  %p1082_p12 = pnand %p826_p9, %p1055_p5  ;;  %s1086_s22 = int_to_ptr.vmem [resolvable:$true] %s248_s22 }
  0x14   : > { %s1088_s29 = scalar_lea.sflag [#allocation3], %s237_s15  ;;  %s872_s8 = scalar_lea.hbm %s1078_s20, 256 }
  0x15   : > { %p873_p13 = scmp.ne.s32.totalorder %s1078_s20, %s872_s8  ;;  %p874_p0 = pneg %p1082_p12 }
  0x16   : > { %s877_s16 = scalar_lea.hbm %s1250_s0, 768  ;;  %p878_p3 = scmp.lt.u32.totalorder %s1078_s20, %s1250_s0 }
  0x17   : > { %p875_p1 = pnand %p874_p0, %p873_p13  ;;  %p879_p4 = scmp.lt.u32.totalorder %s877_s16, %s872_s8 }
  0x18   : > { %p881_p7 = scmp.lt.u32.totalorder %s872_s8, %s1078_s20 }
  0x19   : > { %p876_p2 = pneg %p875_p1  ;;  %p880_p5 = por %p879_p4, %p878_p3 }
  0x1b   : > { %p882_p8 = por %p881_p7, %p880_p5 }
  0x1d   : > { %p883_p9 = pnand %p882_p8, %p876_p2 }
  0x1f   : > { %886 = shalt.err (!%p883_p9)
}
  0x20   : > { %s887_s15 = scalar_lea.vmem %s1086_s22, 256  ;;  %s970_s19 = smov [#allocation2]  }
  0x21   : > { %p888_p13 = scmp.ne.s32.totalorder %s1086_s22, %s887_s15  ;;  %s892_s21 = sshll.u32 %s970_s19, 4  ;;  %s893_s21 = int_to_ptr.vmem [resolvable:$false] %s892_s21 }
  0x22   : > { %s894_s9 = scalar_lea.vmem %s893_s21, 512  ;;  %p895_p10 = scmp.lt.s32.totalorder %s1086_s22, %s893_s21 }
  0x23   : > { %p890_p1 = pnand %p888_p13, %p874_p0  ;;  %p896_p3 = scmp.lt.s32.totalorder %s894_s9, %s887_s15 }
  0x25   : > { %p891_p11 = pneg %p890_p1  ;;  %p897_p4 = por %p896_p3, %p895_p10 }
  0x27   : > { %p898_p5 = pnand %p897_p4, %p891_p11 }
  0x29   : > { %901 = shalt.err (!%p898_p5)
}
  0x2a   : > { %s971_s8 = smov 128   ;;  %s972_s11 = smov 8  }
  0x2b   : > { %821 = dma.hbm_to_vmem [thread:$0]  (!%p1082_p12), %s1078_s20, 256, %s1086_s22, %s1088_s29, %s971_s8, %s971_s8, %s972_s11  }
  0x2c   : > { %p695_p0 = scmp.ge.s32.totalorder %s968_s27, 1  ;;  %p256_p2 = scmp.lt.s32.totalorder %s968_s27, 4 }
  0x2e   : > { %p257_p7 = pnand %p695_p0, %p256_p2 }
  0x2f   : > { %s1119_s16 = sand.u32 (!%p257_p7), 1, %s960_s25  }
  0x30   : > { %260 = sbr.rel (%p257_p7) target bundleno = 767 (0x2ff), region = 48  ;;  %s696_s17 = sshll.u32 (!%p257_p7), %s1119_s16, 4 }
  0x31   : > { %s263_s18 = scalar_lea.sflag (!%p257_p7), [#allocation3], %s1119_s16  ;;  %s1125_s15 = scalar_lea.vmem (!%p257_p7), [#allocation2], %s696_s17 }
  0x37   : > { %947 = dma.done.wait (%p1059_p6), %s263_s18, 256  }
  0x38   : > { %949 = vsyncadd (%p1059_p6), %s263_s18, 4294967040  ;;  %v301_v0 = vld [vmem:[%s1251_s1] sm:$0xff]  ;;  %v302_v1 = vld [vmem:[%s1251_s1 + $0x8] sm:$0xff]  ;;  %vm316_vm0 = vcmask 523264   ;;  %vm516_vm1 = vcmask 64512   ;;  %s715_s9 = sshll.u32 %s1037_s28, 8 }
  0x39   : > { %v303_v2 = vld [vmem:[%s1251_s1 + $0x10] sm:$0xff]  ;;  %v782_v3 = vpack.c.bf16 %v302_v1, %v301_v0  ;;  %v304_v4 = vld [vmem:[%s1251_s1 + $0x18] sm:$0xff]  ;;  %v305_v6 = vld [vmem:[%s1251_s1 + $0x20] sm:$0xff]  ;;  %s296_s8 = scalar_lea.vmem [#allocation5], %s696_s17  ;;  %s1203_s20 = scalar_lea.hbm %s1257_s7, %s715_s9 }
  0x3a   : > { %v786_v5 = vpack.c.bf16 %v304_v4, %v303_v2  ;;  %v306_v7 = vld [vmem:[%s1251_s1 + $0x28] sm:$0xff]  ;;  %v299_v8 = vld [vmem:[%s1125_s15] sm:$0xff]  ;;  %v401_v13 = vld [vmem:[%s1253_s3 + $0x18] sm:$0xff]  ;;  %s616_s12 = sshll.u32 %s296_s8, 4  ;;  %s603_s28 = scalar_lea.sflag [#allocation4], %s1119_s16  ;;  %s1205_s12 = int_to_ptr.vmem [resolvable:$true] %s616_s12 }
  0x3b   : > { %783 = vmatprep.subr.bf16.mxu0 %v782_v3  ;;  %755 = vmatprep.mubr.msk.f32.mxu0 %vm316_vm0, %v299_v8  ;;  %v398_v9 = vld [vmem:[%s1253_s3] sm:$0xff]  ;;  %v399_v10 = vld [vmem:[%s1253_s3 + $0x8] sm:$0xff]  ;;  %v400_v12 = vld [vmem:[%s1253_s3 + $0x10] sm:$0xff]  ;;  %v790_v14 = vpack.c.bf16 %v306_v7, %v305_v6  ;;  %s902_s17 = scalar_lea.vmem %s1205_s12, 256  ;;  %p1264_p10 = scmp.ne.s32.totalorder %s1261_s13, 0 }
  0x3c   : > { %785 = vmatpush3.bf16.msra.mxu0 %v782_v3  ;;  %v798_v11 = vpack.c.bf16 %v399_v10, %v398_v9  ;;  %v802_v15 = vpack.c.bf16 %v401_v13, %v400_v12  ;;  %v402_v16 = vld [vmem:[%s1253_s3 + $0x20] sm:$0xff]  ;;  %v403_v17 = vld [vmem:[%s1253_s3 + $0x28] sm:$0xff]  ;;  %v307_v18 = vld [vmem:[%s1251_s1 + $0x30] sm:$0xff]  ;;  %p903_p6 = scmp.ne.s32.totalorder %s1205_s12, %s902_s17 }
  0x3d   : > { %787 = vmatprep.subr.bf16.mxu0 %v786_v5  ;;  %v308_v19 = vld [vmem:[%s1251_s1 + $0x38] sm:$0xff]  ;;  %v806_v20 = vpack.c.bf16 %v403_v17, %v402_v16  ;;  %v404_v23 = vld [vmem:[%s1253_s3 + $0x30] sm:$0xff]  ;;  %v698_v26 = vld [vmem:[%s1252_s2] ss:$0 sm:$0xff] }
  0x3e   : > { %799 = vmatprep.subr.bf16.mxu1 %v798_v11  ;;  %v794_v21 = vpack.c.bf16 %v308_v19, %v307_v18  ;;  %v300_v22 = vld [vmem:[%s1125_s15 + $0x8] sm:$0xff]  ;;  %v508_v31 = vld [vmem:[%s1255_s5] sm:$0xff]  ;;  %p904_p11 = pnand %p903_p6, %p1264_p10  ;;  %s973_s15 = smov [#allocation5]  }
  0x3f   : > { %801 = vmatpush3.bf16.msra.mxu1 %v798_v11  ;;  %v405_v24 = vld [vmem:[%s1253_s3 + $0x38] sm:$0xff]  ;;  %v701_v32 = vld [vmem:[%s1254_s4] ss:$0 sm:$0xff]  ;;  %s906_s22 = sshll.u32 %s973_s15, 4  ;;  %s907_s22 = int_to_ptr.vmem [resolvable:$false] %s906_s22 }
  0x40   : > { %789 = vmatpush3.bf16.msra.mxu0 %v786_v5  ;;  %803 = vmatprep.subr.bf16.mxu1 %v802_v15  ;;  %v810_v25 = vpack.c.bf16 %v405_v24, %v404_v23  ;;  %v706_v47 = vld [vmem:[%s1256_s6] ss:$0 sm:$0xff]  ;;  %p905_p12 = pneg %p904_p11  ;;  %s908_s23 = scalar_lea.vmem %s907_s22, 512 }
  0x41   : > { %791 = vmatprep.subr.bf16.mxu0 %v790_v14  ;;  %p909_p8 = scmp.lt.s32.totalorder %s1205_s12, %s907_s22  ;;  %p910_p9 = scmp.lt.s32.totalorder %s908_s23, %s902_s17 }
  0x43   : > { %805 = vmatpush3.bf16.msra.mxu1 %v802_v15  ;;  %p911_p13 = por %p910_p9, %p909_p8 }
  0x44   : > { %793 = vmatpush3.bf16.msra.mxu0 %v790_v14  ;;  %807 = vmatprep.subr.bf16.mxu1 %v806_v20 }
  0x45   : > { %795 = vmatprep.subr.bf16.mxu0 %v794_v21  ;;  %p912_p1 = pnand %p911_p13, %p905_p12 }
  0x47   : > { %809 = vmatpush3.bf16.msra.mxu1 %v806_v20 }
  0x48   : > { %797 = vmatpush3.bf16.msra.mxu0 %v794_v21  ;;  %811 = vmatprep.subr.bf16.mxu1 %v810_v25 }
  0x49   : > { %777 = vmatprep.subr.mxu0 %v508_v31 }
  0x4b   : > { %756 = vmatmul.mubr.msk.f32.vlgmr.msra.gmra.mrb[0].mxu0 %vm316_vm0, %v300_v22  ;;  %813 = vmatpush3.bf16.msra.mxu1 %v810_v25 }
  0x4c   : > { %778 = vmatpush3.msra.mxu0 %v508_v31 }
 0x11e   : > { %v757_v27 = vpop.f32.mrb[0].mxu0 }
 0x11f   : > { %v389_v28 = vpop.f32.mrb[1].mxu0  ;;  %v395_v30 = vadd.f32 %v757_v27, %v698_v26 }
 0x120   : > { %v390_v29 = vadd.f32 %v698_v26, %v389_v28 }
 0x122   : > { %774 = vmatprep.mubr.msk.f32.mxu1 %vm316_vm0, %v390_v29 }
 0x123   : > { %775 = vmatmul.mubr.msk.f32.vlgmr.msra.gmra.mrb[0].mxu1 %vm316_vm0, %v395_v30 }
 0x1f6   : > { %v776_v33 = vpop.f32.mrb[0].mxu1 }
 0x1f7   : > { %v491_v34 = vadd.f32 %v776_v33, %v701_v32  ;;  %v485_v35 = vpop.f32.mrb[1].mxu1 }
 0x1f8   : > { %v486_v36 = vadd.f32 %v701_v32, %v485_v35 }
 0x1f9   : > { %v705_v37 = vmul.f32 -1.442695, %v491_v34 }
 0x1fa   : > { %v704_v38 = vmul.f32 -1.442695, %v486_v36 }
 0x1fb   : > { %864 = vpow2.f32 %v705_v37 }
 0x1fc   : > { %866 = vpow2.f32 %v704_v38 }
 0x205   : > { %v865_v39 = vpop.eup %864 }
 0x206   : > { %v867_v40 = vpop.eup %866  ;;  %v501_v41 = vadd.f32 1.0, %v865_v39 }
 0x207   : > { %v500_v42 = vadd.f32 1.0, %v867_v40 }
 0x208   : > { %868 = vrcp.f32 %v501_v41 }
 0x209   : > { %870 = vrcp.f32 %v500_v42 }
 0x212   : > { %v869_v43 = vpop.eup %868 }
 0x213   : > { %v871_v44 = vpop.eup %870  ;;  %v507_v46 = vmul.f32 %v869_v43, %v491_v34 }
 0x214   : > { %v506_v45 = vmul.f32 %v871_v44, %v486_v36 }
 0x216   : > { %779 = vmatprep.mubr.msk.f32.mxu0 %vm516_vm1, %v506_v45 }
 0x217   : > { %780 = vmatmul.mubr.msk.f32.vlgmr.msra.gmra.mrb[2].mxu0 %vm516_vm1, %v507_v46 }
 0x2ea   : > { %v781_v48 = vpop.f32.mrb[2].mxu0 }
 0x2eb   : > { %v595_v49 = vadd.f32 %v781_v48, %v706_v47  ;;  %v589_v50 = vpop.f32.mrb[3].mxu0 }
 0x2ec   : > { %v590_v51 = vadd.f32 %v706_v47, %v589_v50 }
 0x2ed   : > { %v599_v52 = vadd.f32 %v595_v49, %v395_v30 }
 0x2ee   : > { %v598_v53 = vadd.f32 %v590_v51, %v390_v29 }
 0x2ef   : > { %601 = vst.msk [vmem:[%s296_s8 + $0x8] sm:$0xff] %vm316_vm0, %v599_v52 }
 0x2f0   : > { %600 = vst.msk [vmem:[%s296_s8] sm:$0xff] %vm316_vm0, %v598_v53 }
 0x2f1   : > { %915 = shalt.err (!%p912_p1)
}
 0x2f2   : > { %s916_s29 = scalar_lea.hbm %s1203_s20, 256  ;;  %s920_s9 = scalar_lea.hbm %s1257_s7, 768 }
 0x2f3   : > { %p917_p3 = scmp.ne.s32.totalorder %s1203_s20, %s916_s29  ;;  %p921_p0 = scmp.lt.u32.totalorder %s1203_s20, %s1257_s7 }
 0x2f4   : > { %p922_p2 = scmp.lt.u32.totalorder %s920_s9, %s916_s29  ;;  %p924_p6 = scmp.lt.u32.totalorder %s916_s29, %s1203_s20 }
 0x2f5   : > { %p918_p4 = pnand %p917_p3, %p1264_p10 }
 0x2f6   : > { %p923_p7 = por %p922_p2, %p921_p0 }
 0x2f7   : > { %p919_p5 = pneg %p918_p4 }
 0x2f8   : > { %p925_p11 = por %p924_p6, %p923_p7 }
 0x2fa   : > { %p926_p12 = pnand %p925_p11, %p919_p5 }
 0x2fc   : > { %929 = shalt.err (!%p926_p12)
}
 0x2fd   : > { %s974_s18 = smov 128   ;;  %s975_s17 = smov 8  }
 0x2fe   : > { %816 = dma.vmem_to_hbm [thread:$0]  (%p1264_p10), %s1205_s12, 256, %s1203_s20, %s603_s28, %s974_s18, %s974_s18, %s975_s17  }
 0x2ff PF: > { %p827_p8 = scmp.ge.s32.totalorder %s968_s27, 2  ;;  %s631_s15 = sand.u32 1, %s956_s24  }
 0x300   : > { %p1265_p9 = scmp.ne.s32.totalorder %s1262_s14, 0  ;;  %s632_s22 = scalar_lea.sflag [#allocation4], %s631_s15 }
 0x302   : > { %p823_p13 = pnand %p827_p8, %p1265_p9 }
 0x304   : > { %951 = dma.done.wait (!%p823_p13), %s632_s22, 256  }
 0x305   : > { %953 = vsyncadd (!%p823_p13), %s632_s22, 4294967040  ;;  %p20_p1 = scmp.ge.s32.totalorder %s1041_s30, 5   ;;  %s1266_s24 = smov %s960_s25 }
 0x306   : > { %s1267_s25 = smov %s964_s26  ;;  %s1268_s26 = smov %s1053_s10 }
 0x307   : > { %s1269_s27 = smov %s1041_s30  ;;  %22 = sbr.rel (!%p20_p1) target bundleno = 5 (0x5), region = 93 }
 0x30e   :  { %637 = vsyncpa [#allocation3], 1 }
 0x30f   :  { %639 = vsyncpa [#allocation3 + $0x1], 1 }
 0x310   :  { %640 = vsyncpa [#allocation4], 1 }
 0x311   :  { %642 = vsyncpa [#allocation4 + $0x1], 1 }

</bundles_post_ra>
